<compile_context>
chip_gen: v7x
topology: tpu7x:2x2x1
jax: 0.10.0
libtpu: 0.0.40
codegen_flags: <defaults>
</compile_context>

<pallas_src>
import jax
import jax.numpy as jnp
from jax import lax
from jax.experimental import pallas as pl
from jax.experimental.pallas import tpu as pltpu

ALPHA = 0.5                     # FocalLossHeatmap(alpha=0.5, gamma=2)
EPS = 1e-6
_VMEM_LIMIT = 32 * 1024 * 1024  # safe scoped budget on v5e/v6e/v7x


def _round_up(n, m):
    return -(-n // m) * m


def _pick_tile(n, unit, max_tile):
    """Largest tile (multiple of `unit`, <= max_tile) minimizing padding of n."""
    n_u = _round_up(n, unit)
    if n_u <= max_tile:
        return n_u
    tol = max(unit, n // 100)                 # accept <=~1% padding
    best_t, best_w = unit, None
    for t in range(max_tile, unit - 1, -unit):
        w = _round_up(n, t) - n
        if w <= tol:
            return t
        if best_w is None or w < best_w:
            best_t, best_w = t, w
    return best_t


# --------------------------------------------------------------------------
# Focal heatmap loss (CenterNet penalty-reduced focal loss; pred is a
# post-sigmoid probability).  Inputs are sublane-packed to (B, S, 128) so the
# tile fills full vregs regardless of C.  Partial sums accumulate in the
# resident (1,8,128) output block across HW tiles (lanes 0/1/2 = pos / neg /
# num_pos); a tiny JAX epilogue combines over the batch.
# --------------------------------------------------------------------------
def _make_focal_kernel(ts, chw, padded):
    def kernel(idx_ref, pred_ref, tgt_ref, out_ref):
        del idx_ref  # only consumed by the BlockSpec index_map (index_select)
        t_idx = pl.program_id(1)
        p = jnp.clip(pred_ref[0], EPS, 1.0 - EPS)      # (TS, 128) f32
        t = tgt_ref[0]                                 # (TS, 128) f32

        pos_b = t == 1.0                               # torch: target.eq(1)
        pos = pos_b.astype(jnp.float32)
        neg = 1.0 - pos
        if padded:
            # zero-padded tail: pos is already 0 there, only neg needs masking
            sub = lax.broadcasted_iota(jnp.int32, (ts, 128), 0)
            lan = lax.broadcasted_iota(jnp.int32, (ts, 128), 1)
            flat = (t_idx * ts + sub) * 128 + lan
            neg = neg * (flat < chw).astype(jnp.float32)

        lg = jnp.log(jnp.where(pos_b, p, 1.0 - p))     # one EUP log / element
        omp = 1.0 - p
        omt = 1.0 - t
        neg_w = omt * omt
        neg_w = neg_w * neg_w                          # (1 - t)^4
        pos_l = ALPHA * (omp * omp) * lg * pos
        neg_l = (1.0 - ALPHA) * (p * p) * lg * neg_w * neg

        lane = lax.broadcasted_iota(jnp.int32, (8, 128), 1)
        blk = (jnp.where(lane == 0, jnp.sum(pos_l), 0.0)
               + jnp.where(lane == 1, jnp.sum(neg_l), 0.0)
               + jnp.where(lane == 2, jnp.sum(pos), 0.0))

        @pl.when(t_idx == 0)
        def _():
            out_ref[...] = jnp.zeros_like(out_ref)

        out_ref[...] += blk[None]

    return kernel


def focal_heatmap_loss(pred, target, heat_idx):
    """pred: (B, C, H, W); target: (Bt, C, H, W); heat_idx: (B,) rows of target."""
    B, C, H, W = pred.shape
    Bt = target.shape[0]
    chw = C * H * W
    s_raw = pl.cdiv(chw, 128)
    ts = _pick_tile(s_raw, 8, 4096)        # block = ts*128*4B <= 2 MiB
    s_pad = _round_up(s_raw, ts)
    n_t = s_pad // ts
    padded = (s_pad * 128) != chw

    # f32 straight into the kernel (no bf16 double pass); free reshape.
    pred_f = pred.reshape(B, chw).astype(jnp.float32)
    tgt_f = target.reshape(Bt, chw).astype(jnp.float32)
    if padded:
        pad = s_pad * 128 - chw
        pred_f = jnp.pad(pred_f, ((0, 0), (0, pad)))
        tgt_f = jnp.pad(tgt_f, ((0, 0), (0, pad)))
    pred_p = pred_f.reshape(B, s_pad, 128)
    tgt_p = tgt_f.reshape(Bt, s_pad, 128)

    grid_spec = pltpu.PrefetchScalarGridSpec(
        num_scalar_prefetch=1,
        grid=(B, n_t),
        in_specs=[
            pl.BlockSpec((1, ts, 128), lambda b, t, idx: (b, t, 0)),
            # torch.index_select(target, 0, heat_idx): data-dependent index_map;
            # only the B selected rows of the Bt-row target are streamed.
            pl.BlockSpec((1, ts, 128), lambda b, t, idx: (idx[b], t, 0)),
        ],
        out_specs=pl.BlockSpec((1, 8, 128), lambda b, t, idx: (b, 0, 0)),
    )
    parts = pl.pallas_call(
        _make_focal_kernel(ts, chw, padded),
        out_shape=jax.ShapeDtypeStruct((B, 8, 128), jnp.float32),
        grid_spec=grid_spec,
        compiler_params=pltpu.CompilerParams(
            dimension_semantics=("parallel", "arbitrary"),
            vmem_limit_bytes=_VMEM_LIMIT),
    )(heat_idx.astype(jnp.int32), pred_p, tgt_p)

    s = parts.sum(axis=0)                   # tiny JAX epilogue
    pos_s, neg_s, npos = s[0, 0], s[0, 1], s[0, 2]
    return jnp.where(npos > 0.0,
                     -(pos_s + neg_s) / jnp.maximum(npos, 1.0),
                     -neg_s)


# --------------------------------------------------------------------------
# Fused L1LossWithInd kernel for N regression branches sharing (ind, ind_mask).
#   feat = transpose_and_gather(pred, ind);  loss = sum(|feat*m - tgt*m|)
#                                                   / (sum(m)*C + 1e-4)
# The gather is one MXU contraction per HW tile:
#   gathered[c, k] = sum_j pred[c, j] * onehot[k, j]   (precision=HIGHEST)
# accumulated over the HW-tile grid axis in a (C_tot, K) VMEM scratch.
# Per-batch numerator/denominator go to lanes (2i, 2i+1) of the (8,128) output.
# --------------------------------------------------------------------------
def _make_l1_kernel(channels, t_hw, k):
    def kernel(ind_ref, mask_ref, pred_ref, tgt_ref, out_ref, acc_ref):
        t = pl.program_id(1)

        @pl.when(t == 0)
        def _():
            acc_ref[...] = jnp.zeros_like(acc_ref)

        idx = ind_ref[0]                                           # (K, 1) i32
        pos = lax.broadcasted_iota(jnp.int32, (k, t_hw), 1) + t * t_hw
        onehot = (pos == idx).astype(jnp.float32)                  # (K, T)
        # Exact f32 gather on the MXU (one-hot rows, HIGHEST precision).
        acc_ref[...] += lax.dot_general(
            pred_ref[0], onehot,
            dimension_numbers=(((1,), (1,)), ((), ())),
            preferred_element_type=jnp.float32,
            precision=lax.Precision.HIGHEST)                       # (C_tot, K)

        @pl.when(t == pl.num_programs(1) - 1)
        def _():
            g = acc_ref[...]                                       # (C_tot, K)
            tg = tgt_ref[0]                                        # (C_tot, K)
            m = mask_ref[0]                                        # (1, K)
            msum = jnp.sum(m)
            lane = lax.broadcasted_iota(jnp.int32, (8, 128), 1)
            blk = jnp.zeros((8, 128), jnp.float32)
            off = 0
            for i, c in enumerate(channels):                       # static, tiny
                d = jnp.abs(g[off:off + c, :] * m - tg[off:off + c, :] * m)
                blk = (blk
                       + jnp.where(lane == 2 * i, jnp.sum(d), 0.0)
                       + jnp.where(lane == 2 * i + 1, msum * float(c), 0.0))
                off += c
            out_ref[...] = blk[None]

    return kernel


def l1_losses_with_ind(branches, ind, ind_mask):
    """branches: list of (pred NCHW, target (B,K,C)); returns unweighted losses."""
    preds = [p for p, _ in branches]
    tgts = [t for _, t in branches]
    B, _, H, W = preds[0].shape
    HW = H * W
    K = ind.shape[1]
    channels = tuple(p.shape[1] for p in preds)
    c_tot = sum(channels)

    t_hw = _pick_tile(HW, 128, 2048)
    hw_pad = _round_up(HW, t_hw)
    n_hw = hw_pad // t_hw

    # Stack both heads along the channel (sublane) axis so ONE dot covers
    # offset + width_height.  (L1 pred stream is tiny vs. the heatmaps; XLA
    # typically fuses the concat with the producers.)  Zero-padded HW tail is
    # exactly harmless: ind < HW so the one-hot never selects padded lanes.
    pred_all = jnp.concatenate(
        [p.reshape(B, c, HW).astype(jnp.float32)
         for p, c in zip(preds, channels)], axis=1)
    if hw_pad != HW:
        pred_all = jnp.pad(pred_all, ((0, 0), (0, 0), (0, hw_pad - HW)))
    # Lane-dense targets: (B, K, C) -> (B, C, K), concatenated along channels.
    tgt_all = jnp.concatenate(
        [jnp.transpose(t.astype(jnp.float32), (0, 2, 1)) for t in tgts], axis=1)
    ind3 = ind.astype(jnp.int32).reshape(B, K, 1)
    mask3 = ind_mask.astype(jnp.float32).reshape(B, 1, K)

    parts = pl.pallas_call(
        _make_l1_kernel(channels, t_hw, K),
        out_shape=jax.ShapeDtypeStruct((B, 8, 128), jnp.float32),
        grid=(B, n_hw),
        in_specs=[
            pl.BlockSpec((1, K, 1), lambda b, t: (b, 0, 0)),
            pl.BlockSpec((1, 1, K), lambda b, t: (b, 0, 0)),
            pl.BlockSpec((1, c_tot, t_hw), lambda b, t: (b, 0, t)),
            pl.BlockSpec((1, c_tot, K), lambda b, t: (b, 0, 0)),
        ],
        out_specs=pl.BlockSpec((1, 8, 128), lambda b, t: (b, 0, 0)),
        scratch_shapes=[pltpu.VMEM((c_tot, K), jnp.float32)],
        compiler_params=pltpu.CompilerParams(
            dimension_semantics=("parallel", "arbitrary"),
            vmem_limit_bytes=_VMEM_LIMIT),
    )(ind3, mask3, pred_all, tgt_all)

    s = parts.sum(axis=0)                   # tiny JAX epilogue
    return [s[0, 2 * i] / (s[0, 2 * i + 1] + 1e-4) for i in range(len(channels))]


# --------------------------------------------------------------------------
# Module wrapper (no trainable parameters; only the loss_weight dict).
# --------------------------------------------------------------------------
class CenterNetMulBranchLoss:
    def __init__(self, loss_parts, num_branches, loss_weight=None):
        self.loss_parts = loss_parts
        self.num_branches = num_branches
        if loss_weight is None:
            loss_weight = {'heatmap': 1.0, 'offset': 0.5, 'width_height': 0.01}
        self.loss_weight = loss_weight

    def __call__(self, pred, targets, heatmap_indexes):
        losses = {}
        if 'heatmap' in self.loss_parts:
            losses['heatmap'] = jnp.float32(0.0)
            # The reference loop *overwrites* losses['heatmap'] each iteration,
            # so only the LAST branch contributes; skip the dead kernel launches.
            if self.num_branches > 0:
                i = self.num_branches - 1
                losses['heatmap'] = focal_heatmap_loss(
                    pred['heatmap'][i], targets['heatmap'][i], heatmap_indexes[i]
                ) * self.loss_weight['heatmap']

        # Fuse the two L1 heads into a single pallas_call (shared ind / mask).
        l1_branches, l1_names = [], []
        if 'offset' in self.loss_parts:
            l1_branches.append((pred['offset'], targets['offset']))
            l1_names.append('offset')
        if 'width_height' in self.loss_parts:
            l1_branches.append((pred['width_height'], targets['width_height']))
            l1_names.append('width_height')
        if l1_branches:
            vals = l1_losses_with_ind(l1_branches, targets['ind'],
                                      targets['ind_mask'])
            for name, v in zip(l1_names, vals):
                losses[name] = v * self.loss_weight[name]
        return losses


# --------------------------------------------------------------------------
# Pure-JAX references for self-verification (full f32, no casts).
# --------------------------------------------------------------------------
def _focal_ref(pred, target, idx):
    t = target[idx]
    p = jnp.clip(pred, EPS, 1.0 - EPS)
    pos = (t == 1.0).astype(jnp.float32)
    neg = 1.0 - pos
    omt = 1.0 - t
    neg_w = (omt * omt) * (omt * omt)
    pos_l = ALPHA * (1.0 - p) ** 2 * jnp.log(p) * pos
    neg_l = (1.0 - ALPHA) * p ** 2 * jnp.log(1.0 - p) * neg_w * neg
    npos = pos.sum()
    return jnp.where(npos > 0.0,
                     -(pos_l.sum() + neg_l.sum()) / jnp.maximum(npos, 1.0),
                     -neg_l.sum())


def _l1_ref(pred, ind, mask, target):
    B, C, H, W = pred.shape
    feat = jnp.transpose(pred.reshape(B, C, H * W), (0, 2, 1))      # (B, HW, C)
    gathered = jax.vmap(lambda f, i: f[i])(feat, ind)               # (B, K, C)
    m = mask.astype(jnp.float32)[..., None]
    num = jnp.sum(jnp.abs(gathered * m - target * m))
    den = jnp.sum(m * jnp.ones_like(gathered)) + 1e-4
    return num / den


if __name__ == "__main__":
    key = jax.random.PRNGKey(0)
    B, Bt, C_hm, H, W, K = 2, 4, 4, 16, 16, 8
    num_branches = 2
    ks = jax.random.split(key, 12)

    # predictions (heatmaps are post-sigmoid probabilities)
    pred_hm = [jax.nn.sigmoid(jax.random.normal(ks[i], (B, C_hm, H, W), jnp.float32))
               for i in range(num_branches)]
    pred_off = jax.random.normal(ks[2], (B, 2, H, W), jnp.float32)
    pred_wh = jax.random.normal(ks[3], (B, 2, H, W), jnp.float32)

    # targets
    tgt_hm = []
    for i in range(num_branches):
        t = jax.nn.sigmoid(jax.random.normal(ks[4 + i], (Bt, C_hm, H, W), jnp.float32) - 2.0)
        t = t.at[:, :, 4, 4].set(1.0).at[:, :, 10, 7].set(1.0)      # exact peaks
        tgt_hm.append(t)
    ind = jax.random.randint(ks[6], (B, K), 0, H * W, dtype=jnp.int32)
    ind_mask = (jax.random.uniform(ks[7], (B, K)) > 0.3).astype(jnp.int32)
    tgt_off = jax.random.uniform(ks[8], (B, K, 2), dtype=jnp.float32)
    tgt_wh = jax.random.uniform(ks[9], (B, K, 2), dtype=jnp.float32) * 10.0

    heatmap_indexes = [jnp.array([1, 3], jnp.int32), jnp.array([0, 2], jnp.int32)]

    pred = {'heatmap': pred_hm, 'offset': pred_off, 'width_height': pred_wh}
    targets = {'heatmap': tgt_hm, 'ind': ind, 'ind_mask': ind_mask,
               'offset': tgt_off, 'width_height': tgt_wh}

    module = CenterNetMulBranchLoss(('heatmap', 'offset', 'width_height'),
                                    num_branches)
    losses = module(pred, targets, heatmap_indexes)
    losses = {k: jax.block_until_ready(v) for k, v in losses.items()}

    # self-check against pure-JAX f32 references.
    ref = {
        'heatmap': _focal_ref(pred_hm[-1], tgt_hm[-1], heatmap_indexes[-1]) * 1.0,
        'offset': _l1_ref(pred_off, ind, ind_mask, tgt_off) * 0.5,
        'width_height': _l1_ref(pred_wh, ind, ind_mask, tgt_wh) * 0.01,
    }
    for name in ref:
        assert jnp.allclose(losses[name], ref[name], rtol=1e-4, atol=1e-5), (
            name, losses[name], ref[name])

    print("KERNEL_OK")
</pallas_src>

<mosaic_0001>
module attributes {stable_mosaic.version = 11 : i64} {
  func.func @kernel(%arg0: i32, %arg1: i32, %arg2: memref<2xi32, #tpu.memory_space<smem>>, %arg3: memref<1x8x128xf32, #tpu.memory_space<vmem>>, %arg4: memref<1x8x128xf32, #tpu.memory_space<vmem>>, %arg5: memref<1x8x128xf32, #tpu.memory_space<vmem>>) attributes {dimension_semantics = [#tpu.dimension_semantics<parallel>, #tpu.dimension_semantics<arbitrary>], iteration_bounds = array<i64: 2, 1>, scalar_prefetch = 1 : i64, scratch_operands = 0 : i64, tpu.core_type = #tpu.core_type<tc>, window_params = [{transform_indices = @transform_0, window_bounds = array<i64: 1, 8, 128>}, {transform_indices = @transform_1, window_bounds = array<i64: 1, 8, 128>}, {transform_indices = @transform_2, window_bounds = array<i64: 1, 8, 128>}]} {
    %c0 = arith.constant 0 : index
    %c0_0 = arith.constant 0 : index
    %c0_1 = arith.constant 0 : index
    %0 = vector.load %arg3[%c0, %c0_0, %c0_1] : memref<1x8x128xf32, #tpu.memory_space<vmem>>, vector<1x8x128xf32>
    %1 = vector.shape_cast %0 : vector<1x8x128xf32> to vector<8x128xf32>
    %cst = arith.constant 9.99999997E-7 : f32
    %cst_2 = arith.constant 0.999998986 : f32
    %2 = vector.broadcast %cst : f32 to vector<8x128xf32>
    %3 = arith.maximumf %2, %1 : vector<8x128xf32>
    %4 = vector.broadcast %cst_2 : f32 to vector<8x128xf32>
    %5 = arith.minimumf %4, %3 : vector<8x128xf32>
    %c0_3 = arith.constant 0 : index
    %c0_4 = arith.constant 0 : index
    %c0_5 = arith.constant 0 : index
    %6 = vector.load %arg4[%c0_3, %c0_4, %c0_5] : memref<1x8x128xf32, #tpu.memory_space<vmem>>, vector<1x8x128xf32>
    %7 = vector.shape_cast %6 : vector<1x8x128xf32> to vector<8x128xf32>
    %cst_6 = arith.constant 1.000000e+00 : f32
    %8 = vector.broadcast %cst_6 : f32 to vector<8x128xf32>
    %9 = arith.cmpf oeq, %7, %8 : vector<8x128xf32>
    %10 = arith.extui %9 : vector<8x128xi1> to vector<8x128xi32>
    %11 = arith.sitofp %10 : vector<8x128xi32> to vector<8x128xf32>
    %cst_7 = arith.constant 1.000000e+00 : f32
    %12 = vector.broadcast %cst_7 : f32 to vector<8x128xf32>
    %13 = arith.subf %12, %11 : vector<8x128xf32>
    %cst_8 = arith.constant 1.000000e+00 : f32
    %14 = vector.broadcast %cst_8 : f32 to vector<8x128xf32>
    %15 = arith.subf %14, %5 : vector<8x128xf32>
    %16 = arith.select %9, %5, %15 : vector<8x128xi1>, vector<8x128xf32>
    %17 = math.log %16 : vector<8x128xf32>
    %cst_9 = arith.constant 1.000000e+00 : f32
    %18 = vector.broadcast %cst_9 : f32 to vector<8x128xf32>
    %19 = arith.subf %18, %5 : vector<8x128xf32>
    %cst_10 = arith.constant 1.000000e+00 : f32
    %20 = vector.broadcast %cst_10 : f32 to vector<8x128xf32>
    %21 = arith.subf %20, %7 : vector<8x128xf32>
    %22 = arith.mulf %21, %21 : vector<8x128xf32>
    %23 = arith.mulf %22, %22 : vector<8x128xf32>
    %24 = arith.mulf %19, %19 : vector<8x128xf32>
    %cst_11 = arith.constant 5.000000e-01 : f32
    %25 = vector.broadcast %cst_11 : f32 to vector<8x128xf32>
    %26 = arith.mulf %25, %24 : vector<8x128xf32>
    %27 = arith.mulf %26, %17 : vector<8x128xf32>
    %28 = arith.mulf %27, %11 : vector<8x128xf32>
    %29 = arith.mulf %5, %5 : vector<8x128xf32>
    %cst_12 = arith.constant 5.000000e-01 : f32
    %30 = vector.broadcast %cst_12 : f32 to vector<8x128xf32>
    %31 = arith.mulf %30, %29 : vector<8x128xf32>
    %32 = arith.mulf %31, %17 : vector<8x128xf32>
    %33 = arith.mulf %32, %23 : vector<8x128xf32>
    %34 = arith.mulf %33, %13 : vector<8x128xf32>
    %35 = tpu.iota {dimensions = array<i32: 1>} : vector<8x128xi32>
    %c0_i32 = arith.constant 0 : i32
    %36 = vector.broadcast %c0_i32 : i32 to vector<8x128xi32>
    %37 = arith.cmpi eq, %35, %36 : vector<8x128xi32>
    %38 = vector.shape_cast %28 : vector<8x128xf32> to vector<1x8x128xf32>
    %cst_13 = arith.constant dense<0.000000e+00> : vector<1xf32>
    %39 = vector.multi_reduction <add>, %38, %cst_13 [1, 2] : vector<1x8x128xf32> to vector<1xf32>
    %40 = vector.shape_cast %39 : vector<1xf32> to vector<1x1x1xf32>
    %41 = vector.extract %40[0, 0, 0] : f32 from vector<1x1x1xf32>
    %cst_14 = arith.constant 0.000000e+00 : f32
    %42 = vector.broadcast %41 : f32 to vector<8x128xf32>
    %43 = vector.broadcast %cst_14 : f32 to vector<8x128xf32>
    %44 = arith.select %37, %42, %43 : vector<8x128xi1>, vector<8x128xf32>
    %c1_i32 = arith.constant 1 : i32
    %45 = vector.broadcast %c1_i32 : i32 to vector<8x128xi32>
    %46 = arith.cmpi eq, %35, %45 : vector<8x128xi32>
    %47 = vector.shape_cast %34 : vector<8x128xf32> to vector<1x8x128xf32>
    %cst_15 = arith.constant dense<0.000000e+00> : vector<1xf32>
    %48 = vector.multi_reduction <add>, %47, %cst_15 [1, 2] : vector<1x8x128xf32> to vector<1xf32>
    %49 = vector.shape_cast %48 : vector<1xf32> to vector<1x1x1xf32>
    %50 = vector.extract %49[0, 0, 0] : f32 from vector<1x1x1xf32>
    %cst_16 = arith.constant 0.000000e+00 : f32
    %51 = vector.broadcast %50 : f32 to vector<8x128xf32>
    %52 = vector.broadcast %cst_16 : f32 to vector<8x128xf32>
    %53 = arith.select %46, %51, %52 : vector<8x128xi1>, vector<8x128xf32>
    %54 = arith.addf %44, %53 : vector<8x128xf32>
    %c2_i32 = arith.constant 2 : i32
    %55 = vector.broadcast %c2_i32 : i32 to vector<8x128xi32>
    %56 = arith.cmpi eq, %35, %55 : vector<8x128xi32>
    %57 = vector.shape_cast %11 : vector<8x128xf32> to vector<1x8x128xf32>
    %cst_17 = arith.constant dense<0.000000e+00> : vector<1xf32>
    %58 = vector.multi_reduction <add>, %57, %cst_17 [1, 2] : vector<1x8x128xf32> to vector<1xf32>
    %59 = vector.shape_cast %58 : vector<1xf32> to vector<1x1x1xf32>
    %60 = vector.extract %59[0, 0, 0] : f32 from vector<1x1x1xf32>
    %cst_18 = arith.constant 0.000000e+00 : f32
    %61 = vector.broadcast %60 : f32 to vector<8x128xf32>
    %62 = vector.broadcast %cst_18 : f32 to vector<8x128xf32>
    %63 = arith.select %56, %61, %62 : vector<8x128xi1>, vector<8x128xf32>
    %64 = arith.addf %54, %63 : vector<8x128xf32>
    %c0_i32_19 = arith.constant 0 : i32
    %65 = arith.cmpi eq, %arg1, %c0_i32_19 : i32
    %66 = arith.extui %65 : i1 to i32
    %c0_i32_20 = arith.constant 0 : i32
    %67 = arith.cmpi ne, %66, %c0_i32_20 : i32
    scf.if %67 {
      %cst_27 = arith.constant 0.000000e+00 : f32
      %72 = vector.broadcast %cst_27 : f32 to vector<1x8x128xf32>
      %c0_28 = arith.constant 0 : index
      %c0_29 = arith.constant 0 : index
      %c0_30 = arith.constant 0 : index
      %73 = vector.load %arg5[%c0_28, %c0_29, %c0_30] : memref<1x8x128xf32, #tpu.memory_space<vmem>>, vector<1x8x128xf32>
      tpu.vector_store %arg5[%c0_28, %c0_29, %c0_30], %72 {strides = array<i32>} : memref<1x8x128xf32, #tpu.memory_space<vmem>>, vector<1x8x128xf32>,
    } else {
    }
    %c0_21 = arith.constant 0 : index
    %c0_22 = arith.constant 0 : index
    %c0_23 = arith.constant 0 : index
    %68 = vector.load %arg5[%c0_21, %c0_22, %c0_23] : memref<1x8x128xf32, #tpu.memory_space<vmem>>, vector<1x8x128xf32>
    %69 = vector.shape_cast %64 : vector<8x128xf32> to vector<1x8x128xf32>
    %70 = arith.addf %68, %69 : vector<1x8x128xf32>
    %c0_24 = arith.constant 0 : index
    %c0_25 = arith.constant 0 : index
    %c0_26 = arith.constant 0 : index
    %71 = vector.load %arg5[%c0_24, %c0_25, %c0_26] : memref<1x8x128xf32, #tpu.memory_space<vmem>>, vector<1x8x128xf32>
    tpu.vector_store %arg5[%c0_24, %c0_25, %c0_26], %70 {strides = array<i32>} : memref<1x8x128xf32, #tpu.memory_space<vmem>>, vector<1x8x128xf32>,
    return
  }
  func.func @transform_0(%arg0: i32, %arg1: i32, %arg2: memref<2xi32, #tpu.memory_space<smem>>) -> (i32, i32, i32) {
    %c0_i32 = arith.constant 0 : i32
    %c0_i32_0 = arith.constant 0 : i32
    return %arg0, %arg1, %c0_i32 : i32, i32, i32
  }
  func.func @transform_1(%arg0: i32, %arg1: i32, %arg2: memref<2xi32, #tpu.memory_space<smem>>) -> (i32, i32, i32) {
    %0 = arith.index_cast %arg0 : i32 to index
    %1 = memref.load %arg2[%0] : memref<2xi32, #tpu.memory_space<smem>>
    %c0_i32 = arith.constant 0 : i32
    %c0_i32_0 = arith.constant 0 : i32
    return %1, %arg1, %c0_i32 : i32, i32, i32
  }
  func.func @transform_2(%arg0: i32, %arg1: i32, %arg2: memref<2xi32, #tpu.memory_space<smem>>) -> (i32, i32, i32) {
    %c0_i32 = arith.constant 0 : i32
    %c0_i32_0 = arith.constant 0 : i32
    %c0_i32_1 = arith.constant 0 : i32
    return %arg0, %c0_i32, %c0_i32_0 : i32, i32, i32
  }
}

</mosaic_0001>

<bundles_post_ra>
// kernel: tpu_custom_call.1
= control target key start
LH: loop header
LB: loop body
LE: loop exit
PB: predicated region body
PF: predicated region fallthrough
CT: control target
= control target key end

     0   :  { %s1056_s0 = inlined_call_operand.hbm [shape: s32[2], index: 0, kind: input, shape index: {}]   ;;  %s1057_s1 = inlined_call_operand.hbm [shape: f32[2,8,128], index: 1, kind: input, shape index: {}]   ;;  %s1058_s2 = inlined_call_operand.hbm [shape: f32[4,8,128], index: 2, kind: input, shape index: {}]   ;;  %s1059_s3 = inlined_call_operand.hbm [shape: f32[2,8,128], index: 3, kind: output, shape index: {}]  }
   0x1   :  { %1066 = sst [smem:[#allocation17_spill]] %s1057_s1  ;;  %s534_s14 = scalar_lea.hbm %s1056_s0, 16 }
   0x2   :  { %p535_p0 = scmp.ne.s32.totalorder %s1056_s0, %s534_s14  ;;  %p538_p1 = scmp.lt.u32.totalorder %s534_s14, %s1056_s0 }
   0x4   :  { %p540_p2 = pnand %p538_p1, %p535_p0 }
   0x6   :  { %543 = shalt.err (!%p540_p2)  }
   0x7   :  { %s718_s19 = smov [#allocation3]  }
   0x8   :  { %9 = dma.hbm_to_smem %s1056_s0, 16, %s718_s19, [#allocation2] }
   0x9   :  { %668 = dma.done.wait [#allocation2], 16 }
   0xa   :  { %669 = vsyncadd [#allocation2], 4294967280 }
   0xb   :  { %11 = sfence }
   0xc   :  { %12 = vsyncpa [#allocation5], 0 }
   0xd   :  { %14 = vsyncpa [#allocation5 + $0x1], 0 }
   0xe   :  { %15 = vsyncpa [#allocation8], 0 }
   0xf   :  { %17 = vsyncpa [#allocation8 + $0x1], 0 }
  0x10   :  { %18 = vsyncpa [#allocation6], 0 }
  0x11   :  { %20 = vsyncpa [#allocation6 + $0x1], 0  ;;  %s755_s22 = smov 0   ;;  %s757_s23 = smov 0  }
  0x12   :  { %s759_s24 = smov 0   ;;  %s761_s25 = smov 0  }
  0x13   :  { %s763_s26 = smov 0   ;;  %s765_s0 = smov 0  }
  0x14   :  { %s767_s27 = smov 0   ;;  %s769_s28 = smov 0  }
  0x15   :  { %s771_s29 = smov 0  }
  0x16 LB: > { %s412_s30 = sadd.s32 4294967295, %s716_s29   ;;  %s413_s4 = sadd.s32 4294967294, %s716_s29   ;;  %s716_s29 = sphi %s771_s29, %s26_s29   ;;  %s712_s28 = sphi %s769_s28, %s1097_s28   ;;  %s708_s27 = sphi %s767_s27, %s1096_s27   ;;  %s704_s0 = sphi %s765_s0, %s1095_s0   ;;  %s700_s26 = sphi %s763_s26, %s1094_s26   ;;  %s696_s25 = sphi %s761_s25, %s1093_s25   ;;  %s692_s24 = sphi %s759_s24, %s1092_s24   ;;  %s688_s23 = sphi %s757_s23, %s1091_s23   ;;  %s684_s22 = sphi %s755_s22, %s1090_s22  }
  0x17   : > { %s38_s5 = sadd.s32 1, %s712_s28  ;;  %s47_s6 = sadd.s32 1, %s704_s0 }
  0x18   : > { %p40_p3 = scmp.ge.s32.totalorder %s38_s5, 2  ;;  %p54_p4 = scmp.ne.s32.totalorder %s704_s0, %s700_s26 }
  0x19   : > { %p1061_p5 = scmp.eq.s32.totalorder %s716_s29, 0  ;;  %p60_p6 = scmp.ne.s32.totalorder %s700_s26, %s696_s25 }
  0x1a   : > { %s1099_s5 = smov (%p40_p3, %s38_s5), 0  ;;  %p820_p8 = scmp.eq.s32.totalorder %s412_s30, 0 }
  0x1b   : > { %1067 = sst [smem:[#allocation16_spill]] %s1099_s5  ;;  %p816_p7 = por %p1061_p5, %p54_p4 }
  0x1c   : > { %s42_s9 = ssub.s32 %s712_s28, %s1099_s5  ;;  %s827_s10 = sld [smem:[#allocation3 + %s712_s28]] }
  0x1d   : > { %p45_p9 = scmp.eq.s32.totalorder %s42_s9, 0  ;;  %p834_p10 = por %p820_p8, %p60_p6 }
  0x1e   : > { %s839_s12 = sld [smem:[#allocation3 + %s1099_s5]]  ;;  %p114_p11 = scmp.eq.s32.totalorder %s412_s30, 1 }
  0x1f   : > { %s1070_s11 = scalar_select %p834_p10, 1, 0 }
  0x20   : > { %s842_s13 = scalar_select %p45_p9, %s704_s0, %s47_s6  }
  0x21   : > { %p847_p12 = por %p114_p11, %p54_p4  ;;  %p120_p13 = scmp.eq.s32.totalorder %s413_s4, 1 }
  0x22   : > { %p1060_p1 = scmp.lt.s32.totalorder %s716_s29, 2  ;;  %s140_s16 = sand.u32 1, %s704_s0  }
  0x23   : > { %s1071_s14 = scalar_select %p847_p12, 1, 0 }
  0x24   : > { %p856_p2 = por %p120_p13, %p60_p6  ;;  %s416_s17 = sshll.u32 %s140_s16, 3 }
  0x25   : > { %s417_s18 = sshll.u32 %s712_s28, 7  ;;  %s1073_s1 = sld [smem:[#allocation17_spill]] }
  0x26   : > { %s1072_s15 = scalar_select %p856_p2, 1, 0 }
  0x27   : > { %s144_s30 = scalar_lea.vmem [#allocation4], %s416_s17  ;;  %p873_p3 = pnand %p1060_p1, %p816_p7 }
  0x28   : > { %s152_s4 = sshll.u32 %s144_s30, 4  ;;  %s141_s9 = scalar_lea.sflag [#allocation5], %s140_s16  ;;  %s867_s4 = int_to_ptr.vmem [resolvable:$true] %s152_s4 }
  0x29   : > { %p546_p11 = pneg %p873_p3 }
  0x2b   : > { %s865_s21 = scalar_lea.hbm %s1073_s1, %s417_s18  ;;  %s549_s19 = scalar_lea.hbm %s1073_s1, 256 }
  0x2c   : > { %s544_s18 = scalar_lea.hbm %s865_s21, 128  ;;  %p550_p7 = scmp.lt.u32.totalorder %s865_s21, %s1073_s1 }
  0x2d   : > { %p545_p9 = scmp.ne.s32.totalorder %s865_s21, %s544_s18  ;;  %p551_p1 = scmp.lt.u32.totalorder %s549_s19, %s544_s18 }
  0x2e   : > { %p553_p4 = scmp.lt.u32.totalorder %s544_s18, %s865_s21 }
  0x2f   : > { %p547_p13 = pnand %p546_p11, %p545_p9  ;;  %p552_p5 = por %p551_p1, %p550_p7 }
  0x31   : > { %p548_p0 = pneg %p547_p13  ;;  %p554_p6 = por %p553_p4, %p552_p5 }
  0x33   : > { %p555_p2 = pnand %p554_p6, %p548_p0 }
  0x35   : > { %558 = shalt.err (!%p555_p2)
}
  0x36   : > { %s559_s16 = scalar_lea.vmem %s867_s4, 128  ;;  %s719_s17 = smov [#allocation4]  }
  0x37   : > { %p560_p9 = scmp.ne.s32.totalorder %s867_s4, %s559_s16  ;;  %s564_s7 = sshll.u32 %s719_s17, 4  ;;  %s565_s7 = int_to_ptr.vmem [resolvable:$false] %s564_s7 }
  0x38   : > { %s566_s20 = scalar_lea.vmem %s565_s7, 256  ;;  %p567_p10 = scmp.lt.s32.totalorder %s867_s4, %s565_s7 }
  0x39   : > { %p562_p13 = pnand %p560_p9, %p546_p11  ;;  %p568_p1 = scmp.lt.s32.totalorder %s566_s20, %s559_s16 }
  0x3b   : > { %p563_p12 = pneg %p562_p13  ;;  %p569_p7 = por %p568_p1, %p567_p10 }
  0x3d   : > { %p570_p5 = pnand %p569_p7, %p563_p12 }
  0x3f   : > { %573 = shalt.err (!%p570_p5)
}
  0x40   : > { %446 = dma.hbm_to_vmem [thread:$0]  (!%p873_p3), %s865_s21, 128, %s867_s4, %s141_s9  }
  0x41   : > { %p1075_p10 = scmp.lt.s32.totalorder %s716_s29, 3  ;;  %p1076_p12 = scmp.ge.s32.totalorder %s716_s29, 1 }
  0x42   : > { %s72_s18 = ssub.s32 %s827_s10, %s839_s12  ;;  %s77_s19 = sadd.s32 1, %s692_s24 }
  0x43   : > { %p908_p0 = pnand %p1076_p12, %p1075_p10  ;;  %p75_p2 = scmp.eq.s32.totalorder %s72_s18, 0 }
  0x44   : > { %p84_p4 = scmp.ne.s32.totalorder %s692_s24, %s688_s23  ;;  %p90_p6 = scmp.ne.s32.totalorder %s688_s23, %s684_s22 }
  0x45   : > { %s159_s30 = sand.u32 1, %s692_s24   ;;  %p1078_p11 = scmp.eq.s32.totalorder %s716_s29, 0 }
  0x46   : > { %s921_s16 = scalar_select %p75_p2, %s692_s24, %s77_s19  }
  0x47   : > { %p86_p9 = por %p84_p4, %p1078_p11  ;;  %p927_p13 = por %p90_p6, %p820_p8 }
  0x48   : > { %s418_s4 = sshll.u32 %s159_s30, 3  ;;  %p1080_p3 = scmp.lt.s32.totalorder %s716_s29, 2 }
  0x49   : > { %s1079_s21 = scalar_select %p927_p13, 1, 0 }
  0x4a   : > { %p933_p1 = pnand %p1080_p3, %p86_p9  ;;  %p1082_p7 = pmov %p1080_p3 }
  0x4b   : > { %s436_s10 = scalar_select %p86_p9, [#allocation3], [#allocation10] }
  0x4c   : > { %s437_s22 = scalar_select %p86_p9, %s712_s28, 0 }
  0x4d   : > { %s1101_s10 = smov (!%p1082_p7, %s436_s10), [#allocation11]  ;;  %p1083_p5 = pmov %p1080_p3 }
  0x4e   : > { %s163_s8 = scalar_lea.vmem [#allocation7], %s418_s4  ;;  %s160_s1 = scalar_lea.sflag [#allocation8], %s159_s30 }
  0x4f   : > { %s1103_s22 = smov (!%p1083_p5, %s437_s22), 0  ;;  %s172_s17 = sshll.u32 %s163_s8, 4  ;;  %s942_s17 = int_to_ptr.vmem [resolvable:$true] %s172_s17 }
  0x50   : > { %s164_s12 = sld [smem:[%s1101_s10 + %s1103_s22]]  ;;  %p576_p10 = pneg %p933_p1 }
  0x51   : > { %s579_s22 = scalar_lea.hbm %s1058_s2, 512 }
  0x56   : > { %s419_s7 = sshll.u32 %s164_s12, 7 }
  0x57   : > { %s947_s19 = scalar_lea.hbm %s1058_s2, %s419_s7 }
  0x58   : > { %s574_s5 = scalar_lea.hbm %s947_s19, 128  ;;  %p580_p4 = scmp.lt.u32.totalorder %s947_s19, %s1058_s2 }
  0x59   : > { %p575_p8 = scmp.ne.s32.totalorder %s947_s19, %s574_s5  ;;  %p581_p6 = scmp.lt.u32.totalorder %s579_s22, %s574_s5 }
  0x5a   : > { %p583_p9 = scmp.lt.u32.totalorder %s574_s5, %s947_s19 }
  0x5b   : > { %p577_p12 = pnand %p576_p10, %p575_p8  ;;  %p582_p11 = por %p581_p6, %p580_p4 }
  0x5d   : > { %p578_p2 = pneg %p577_p12  ;;  %p584_p3 = por %p583_p9, %p582_p11 }
  0x5f   : > { %p585_p7 = pnand %p584_p3, %p578_p2 }
  0x61   : > { %588 = shalt.err (!%p585_p7)
}
  0x62   : > { %s589_s30 = scalar_lea.vmem %s942_s17, 128  ;;  %s720_s7 = smov [#allocation7]  }
  0x63   : > { %p590_p5 = scmp.ne.s32.totalorder %s942_s17, %s589_s30  ;;  %s594_s20 = sshll.u32 %s720_s7, 4  ;;  %s595_s20 = int_to_ptr.vmem [resolvable:$false] %s594_s20 }
  0x64   : > { %s596_s18 = scalar_lea.vmem %s595_s20, 256  ;;  %p597_p13 = scmp.lt.s32.totalorder %s942_s17, %s595_s20 }
  0x65   : > { %p592_p8 = pnand %p590_p5, %p576_p10  ;;  %p598_p4 = scmp.lt.s32.totalorder %s596_s18, %s589_s30 }
  0x67   : > { %p593_p12 = pneg %p592_p8  ;;  %p599_p6 = por %p598_p4, %p597_p13 }
  0x69   : > { %p600_p11 = pnand %p599_p6, %p593_p12 }
  0x6b   : > { %603 = shalt.err (!%p600_p11)
}
  0x6c   : > { %451 = dma.hbm_to_vmem [thread:$0]  (!%p933_p1), %s947_s19, 128, %s942_s17, %s160_s1  }
  0x6d   : > { %181 = sbr.rel (%p908_p0) target bundleno = 374 (0x176), region = 28  ;;  %s977_s5 = sand.u32 (!%p908_p0), 1, %s700_s26  }
  0x6e   : > { %s421_s4 = sshll.u32 (!%p908_p0), %s977_s5, 3  ;;  %s184_s10 = scalar_lea.sflag (!%p908_p0), [#allocation5], %s977_s5 }
  0x6f   : > { %s187_s22 = scalar_lea.vmem (!%p908_p0), [#allocation4], %s421_s4  ;;  %p1084_p13 = scmp.ne.s32.totalorder (!%p908_p0), %s1070_s11, 0 }
  0x74   : > { %671 = dma.done.wait (%p1084_p13), %s184_s10, 128  }
  0x75   : > { %673 = vsyncadd (%p1084_p13), %s184_s10, 4294967168  ;;  %s192_s1 = sand.u32 1, %s688_s23   ;;  %p1085_p0 = scmp.ne.s32.totalorder %s1079_s21, 0 }
  0x76   : > { %s422_s6 = sshll.u32 %s192_s1, 3  ;;  %s193_s9 = scalar_lea.sflag [#allocation8], %s192_s1 }
  0x77   : > { %s196_s17 = scalar_lea.vmem [#allocation7], %s422_s6 }
  0x78   : > { %675 = dma.done.wait (%p1085_p0), %s193_s9, 128  }
  0x79   : > { %677 = vsyncadd (%p1085_p0), %s193_s9, 4294967168  ;;  %v226_v0 = vld [vmem:[%s196_s17] sm:$0xff]  ;;  %v223_v1 = vld [vmem:[%s187_s22] sm:$0xff]  ;;  %v721_v3 = vmov 0.0   ;;  %v247_v44 = vlaneseq  ;;  %s426_s12 = sshll.u32 %s708_s27, 7  ;;  %s221_s8 = scalar_lea.vmem [#allocation9], %s421_s4 }
  0x7a   : > { %vm227_vm0 = vcmp.eq.f32.partialorder %v226_v0, 1.0  ;;  %v224_v2 = vmax.f32 %v223_v1, 1e-06  ;;  %v235_v8 = vsub.f32 1.0, %v226_v0  ;;  %s309_s30 = sshll.u32 %s221_s8, 4  ;;  %s998_s18 = scalar_lea.hbm %s1059_s3, %s426_s12  ;;  %s1000_s30 = int_to_ptr.vmem [resolvable:$true] %s309_s30 }
  0x7b   : > { %v424_v4 = vsel %vm227_vm0, 1.0, %v721_v3  ;;  %v248_v45 = vand.u32 127, %v247_v44  ;;  %s296_s10 = scalar_lea.sflag [#allocation6], %s977_s5  ;;  %s604_s22 = scalar_lea.vmem %s1000_s30, 128 }
  0x7c   : > { %275 = vadd.xlane.f32.xlu1 %v424_v4  ;;  %v225_v5 = vmin.f32 %v224_v2, 0.999999  ;;  %v236_v11 = vmul.f32 %v235_v8, %v235_v8  ;;  %v230_v18 = vsub.f32 1.0, %v424_v4  ;;  %p605_p1 = scmp.ne.s32.totalorder %s1000_s30, %s604_s22  ;;  %p1086_p10 = scmp.ne.s32.totalorder %s1071_s14, 0 }
  0x7d   : > { %vm249_vm1 = vcmp.eq.s32.totalorder %v248_v45, 0  ;;  %vm261_vm2 = vcmp.eq.s32.totalorder %v248_v45, 1  ;;  %vm274_vm3 = vcmp.eq.s32.totalorder %v248_v45, 2  ;;  %s722_s27 = smov [#allocation9]  }
  0x7e   : > { %v231_v6 = vsub.f32 1.0, %v225_v5  ;;  %v242_v10 = vmul.f32 %v225_v5, %v225_v5  ;;  %v237_v16 = vmul.f32 %v236_v11, %v236_v11  ;;  %p606_p2 = pnand %p605_p1, %p1086_p10  ;;  %s608_s4 = sshll.u32 %s722_s27, 4  ;;  %s609_s4 = int_to_ptr.vmem [resolvable:$false] %s608_s4 }
  0x7f   : > { %s610_s1 = scalar_lea.vmem %s609_s4, 256  ;;  %p611_p3 = scmp.lt.s32.totalorder %s1000_s30, %s609_s4 }
  0x80   : > { %v232_v7 = vsel %vm227_vm0, %v225_v5, %v231_v6  ;;  %v238_v9 = vmul.f32 %v231_v6, %v231_v6  ;;  %v243_v13 = vmul.f32 0.5, %v242_v10  ;;  %p607_p9 = pneg %p606_p2  ;;  %p612_p7 = scmp.lt.s32.totalorder %s610_s1, %s604_s22 }
  0x81   : > { %532 = vlog2.f32 %v232_v7 }
  0x82   : > { %v239_v12 = vmul.f32 0.5, %v238_v9  ;;  %p613_p5 = por %p612_p7, %p611_p3 }
  0x84   : > { %p614_p8 = pnand %p613_p5, %p607_p9 }
  0x8b   : > { %v533_v14 = vpop.eup %532 }
  0x8c   : > { %v234_v15 = vmul.f32 0.6931472, %v533_v14 }
  0x8e   : > { %v240_v17 = vmul.f32 %v239_v12, %v234_v15  ;;  %v244_v19 = vmul.f32 %v243_v13, %v234_v15 }
  0x90   : > { %v241_v20 = vmul.f32 %v424_v4, %v240_v17  ;;  %v245_v21 = vmul.f32 %v244_v19, %v237_v16 }
  0x92   : > { %250 = vadd.xlane.f32.xlu0 %v241_v20  ;;  %v246_v22 = vmul.f32 %v245_v21, %v230_v18 }
  0x96   : > { %262 = vadd.xlane.f32.xlu0 %v246_v22 }
 0x109   : > { %v276_v23 = vpop.xlane.xlu1 %275 }
 0x10a   : > { %v277_v24 = vrot.slane %v276_v23, 4 }
 0x10c   : > { %v278_v25 = vadd.f32 %v277_v24, %v276_v23 }
 0x10e   : > { %v279_v29 = vrot.slane %v278_v25, 2 }
 0x110   : > { %v280_v35 = vadd.f32 %v279_v29, %v278_v25 }
 0x112   : > { %v281_v40 = vrot.slane %v280_v35, 1 }
 0x114   : > { %v282_v43 = vadd.f32 %v281_v40, %v280_v35 }
 0x11f   : > { %v251_v26 = vpop.xlane.xlu0 %250 }
 0x120   : > { %v252_v27 = vrot.slane %v251_v26, 4 }
 0x122   : > { %v253_v28 = vadd.f32 %v252_v27, %v251_v26 }
 0x123   : > { %v263_v30 = vpop.xlane.xlu0 %262 }
 0x124   : > { %v254_v31 = vrot.slane %v253_v28, 2  ;;  %v264_v32 = vrot.slane %v263_v30, 4 }
 0x126   : > { %v265_v33 = vadd.f32 %v264_v32, %v263_v30  ;;  %v255_v34 = vadd.f32 %v254_v31, %v253_v28 }
 0x128   : > { %v266_v36 = vrot.slane %v265_v33, 2  ;;  %v256_v37 = vrot.slane %v255_v34, 1 }
 0x12a   : > { %v267_v38 = vadd.f32 %v266_v36, %v265_v33  ;;  %v257_v39 = vadd.f32 %v256_v37, %v255_v34 }
 0x12c   : > { %429 = vpush %v257_v39  ;;  %v268_v41 = vrot.slane %v267_v38, 1 }
 0x12e   : > { %v269_v42 = vadd.f32 %v268_v41, %v267_v38 }
 0x130   : > { %431 = vpush %v269_v42 }
 0x131   : > { %433 = vpush %v282_v43 }
 0x15d   : > { %s430_s11 = spop %429 }
 0x15e   : > { %v259_v46 = vstv %s430_s11 }
 0x15f   : > { %v260_v48 = vsel %vm249_vm1, %v259_v46, 0.0 }
 0x161   : > { %s432_s21 = spop %431 }
 0x162   : > { %v271_v47 = vstv %s432_s21  ;;  %s434_s19 = spop %433 }
 0x163   : > { %v272_v49 = vsel %vm261_vm2, %v271_v47, 0.0  ;;  %v284_v50 = vstv %s434_s19 }
 0x164   : > { %v273_v51 = vadd.f32 %v272_v49, %v260_v48  ;;  %v285_v52 = vsel %vm274_vm3, %v284_v50, 0.0 }
 0x166   : > { %v286_v53 = vadd.f32 %v285_v52, %v273_v51 }
 0x168   : > { %294 = vst [vmem:[%s221_s8] sm:$0xff] %v286_v53 }
 0x169   : > { %617 = shalt.err (!%p614_p8)
}
 0x16a   : > { %s618_s5 = scalar_lea.hbm %s998_s18, 128  ;;  %s622_s17 = scalar_lea.hbm %s1059_s3, 256 }
 0x16b   : > { %p619_p12 = scmp.ne.s32.totalorder %s998_s18, %s618_s5  ;;  %p623_p11 = scmp.lt.u32.totalorder %s998_s18, %s1059_s3 }
 0x16c   : > { %p624_p13 = scmp.lt.u32.totalorder %s622_s17, %s618_s5  ;;  %p626_p1 = scmp.lt.u32.totalorder %s618_s5, %s998_s18 }
 0x16d   : > { %p620_p4 = pnand %p619_p12, %p1086_p10 }
 0x16e   : > { %p625_p0 = por %p624_p13, %p623_p11 }
 0x16f   : > { %p621_p6 = pneg %p620_p4 }
 0x170   : > { %p627_p2 = por %p626_p1, %p625_p0 }
 0x172   : > { %p628_p9 = pnand %p627_p2, %p621_p6 }
 0x174   : > { %631 = shalt.err (!%p628_p9)
}
 0x175   : > { %441 = dma.vmem_to_hbm [thread:$0]  (%p1086_p10), %s1000_s30, 128, %s998_s18, %s296_s10  }
 0x176 PF: > { %s321_s19 = sand.u32 1, %s696_s25   ;;  %p1087_p3 = scmp.ne.s32.totalorder %s1072_s15, 0 }
 0x177   : > { %p1088_p7 = scmp.ge.s32.totalorder %s716_s29, 2  ;;  %s322_s12 = scalar_lea.sflag [#allocation6], %s321_s19 }
 0x179   : > { %p453_p5 = pnand %p1088_p7, %p1087_p3 }
 0x17b   : > { %679 = dma.done.wait (!%p453_p5), %s322_s12, 128  }
 0x17c   : > { %681 = vsyncadd (!%p453_p5), %s322_s12, 4294967168  ;;  %s26_s29 = sadd.s32 1, %s716_s29   ;;  %s1089_s14 = sld [smem:[#allocation16_spill]] }
 0x17d   : > { %p23_p8 = scmp.ge.s32.totalorder %s26_s29, 4   ;;  %s1090_s22 = smov %s688_s23 }
 0x17e   : > { %s1091_s23 = smov %s692_s24  ;;  %s1092_s24 = smov %s921_s16 }
 0x17f   : > { %s1093_s25 = smov %s700_s26  ;;  %s1094_s26 = smov %s704_s0 }
 0x180   : > { %s1095_s0 = smov %s842_s13  ;;  %s1096_s27 = smov %s712_s28 }
 0x181   :  { %25 = sbr.rel (!%p23_p8) target bundleno = 22 (0x16), region = 90 }
 0x182   : > { %s1097_s28 = smov %s1089_s14 }
 0x188   :  { %327 = vsyncpa [#allocation5], 1 }
 0x189   :  { %329 = vsyncpa [#allocation5 + $0x1], 1 }
 0x18a   :  { %330 = vsyncpa [#allocation8], 1 }
 0x18b   :  { %332 = vsyncpa [#allocation8 + $0x1], 1 }
 0x18c   :  { %333 = vsyncpa [#allocation6], 1 }
 0x18d   :  { %335 = vsyncpa [#allocation6 + $0x1], 1 }

</bundles_post_ra>
